<compile_context>
chip_gen: v6e
topology: v6e:2x2x1
jax: 0.10.0
libtpu: 0.0.40
codegen_flags: <defaults>
</compile_context>

<pallas_src>
import jax
import jax.numpy as jnp
from jax.experimental import pallas as pl
from jax.experimental.pallas import tpu as pltpu


# ---- packed-parameter layout (rows x 128 lanes); every segment starts at a multiple of 8
_H = 128            # padded hidden lane width
_S = 8              # state_dim (input features)
_A = 4              # action_dim (logical output width)
_W1_START = 0       # rows   0:8    -> w1 padded to (8, 128)
_W2_START = 8       # rows   8:136  -> w2 padded to (128, 128)
_W3_START = 136     # rows 136:264  -> w3 padded to (128, 128)
_B1_ROW = 264       # row  264      -> b1 padded to (1, 128)
_B2_ROW = 272       # row  272      -> b2 padded to (1, 128)
_B3_ROW = 280       # row  280      -> b3 padded to (1, 128)
_PACKED_ROWS = 288  # total rows (multiple of 8)


def _mlp_kernel(x_ref, p_ref, o_ref):
    # x_ref: (TM, 8); p_ref: (288, 128) packed params; o_ref: (TM, 4) valid lanes only.
    x = x_ref[...]
    w1 = p_ref[_W1_START:_W1_START + _S, :]      # (8, 128)
    w2 = p_ref[_W2_START:_W2_START + _H, :]      # (128, 128)
    w3 = p_ref[_W3_START:_W3_START + _H, :]      # (128, 128)
    b1 = p_ref[_B1_ROW:_B1_ROW + 1, :]           # (1, 128)
    b2 = p_ref[_B2_ROW:_B2_ROW + 1, :]
    b3 = p_ref[_B3_ROW:_B3_ROW + 1, :]

    h1 = jnp.maximum(jnp.dot(x, w1, preferred_element_type=jnp.float32) + b1, 0.0)
    h2 = jnp.maximum(jnp.dot(h1, w2, preferred_element_type=jnp.float32) + b2, 0.0)
    out = jnp.dot(h2, w3, preferred_element_type=jnp.float32) + b3   # (TM, 128)
    # Only the 4 valid lanes leave the kernel -> 16 B/row of HBM writeback instead of 512 B.
    o_ref[...] = out[:, :_A].astype(o_ref.dtype)


def _round_up(n, m):
    return ((n + m - 1) // m) * m


def _choose_tm(batch, tm):
    """Pick the batch tile: big enough to amortize per-step overhead, capped so large
    batches still produce >= 2 grid steps (keeps both v7x TensorCores busy), and never
    larger than the 8-row-rounded batch."""
    tm = _round_up(max(tm, 8), 8)
    b8 = _round_up(max(batch, 1), 8)
    half = _round_up(pl.cdiv(b8, 2), 256)
    return min(tm, half, b8)


def pack_params(params):
    """Pack all weights/biases into one lane-dense (288, 128) f32 buffer.

    Padded lanes/rows are zero, so they contribute exactly nothing to the valid lanes
    and the padded hidden lanes stay identically zero through the ReLUs.
    """
    w1, b1 = params["w1"], params["b1"]   # (8, 32), (32,)
    w2, b2 = params["w2"], params["b2"]   # (32, 32), (32,)
    w3, b3 = params["w3"], params["b3"]   # (32, 4),  (4,)
    packed = jnp.zeros((_PACKED_ROWS, _H), jnp.float32)
    packed = packed.at[_W1_START:_W1_START + 8, 0:32].set(w1)
    packed = packed.at[_W2_START:_W2_START + 32, 0:32].set(w2)
    packed = packed.at[_W3_START:_W3_START + 32, 0:4].set(w3)
    packed = packed.at[_B1_ROW, 0:32].set(b1)
    packed = packed.at[_B2_ROW, 0:32].set(b2)
    packed = packed.at[_B3_ROW, 0:4].set(b3)
    return packed


def net_forward(x, packed_params, *, tm=4096):
    """Fused MLP forward. x: (B, 8) f32; packed_params: (288, 128) f32 from pack_params.

    Returns the logical (B, 4) result directly -- no wrapper pad or slice ops.
    """
    B = x.shape[0]
    TM = _choose_tm(B, tm)
    grid = (pl.cdiv(B, TM),)   # ragged final block handled by Pallas; rows independent

    return pl.pallas_call(
        _mlp_kernel,
        out_shape=jax.ShapeDtypeStruct((B, _A), jnp.float32),
        grid_spec=pltpu.PrefetchScalarGridSpec(
            num_scalar_prefetch=0,
            grid=grid,
            in_specs=[
                # x: tiled over batch (last dim == full array dim -> legal block shape)
                pl.BlockSpec((TM, _S), lambda i: (i, 0)),
                # packed params: constant block index -> DMA'd once, VMEM-resident
                pl.BlockSpec((_PACKED_ROWS, _H), lambda i: (0, 0)),
            ],
            # (TM, 4) output block: last dim equals the full array dim; only the valid
            # 16 B/row of f32 is written back to HBM.
            out_specs=pl.BlockSpec((TM, _A), lambda i: (i, 0)),
        ),
        compiler_params=pltpu.CompilerParams(
            # batch tiles are independent -> shard the grid across v7x's 2 TensorCores
            dimension_semantics=("parallel",),
        ),
    )(x, packed_params)


def init_params(key):
    """Deterministic init mirroring PyTorch nn.Linear shapes.

    PyTorch stores weight as (out, in) and computes y = x @ W.T + b; we store the
    transposed (in, out) layout so the kernel does plain row-major matmuls.
    """
    def linear(key, fan_in, fan_out):
        kw, kb = jax.random.split(key)
        bound = 1.0 / jnp.sqrt(fan_in)  # PyTorch default Linear init bound
        w = jax.random.uniform(kw, (fan_in, fan_out), jnp.float32, -bound, bound)
        b = jax.random.uniform(kb, (fan_out,), jnp.float32, -bound, bound)
        return w, b

    k1, k2, k3 = jax.random.split(key, 3)
    w1, b1 = linear(k1, 8, 32)
    w2, b2 = linear(k2, 32, 32)
    w3, b3 = linear(k3, 32, 4)
    return {"w1": w1, "b1": b1, "w2": w2, "b2": b2, "w3": w3, "b3": b3}


def _reference_forward(x, p):
    h1 = jnp.maximum(x @ p["w1"] + p["b1"], 0.0)
    h2 = jnp.maximum(h1 @ p["w2"] + p["b2"], 0.0)
    return h2 @ p["w3"] + p["b3"]


if __name__ == "__main__":
    key = jax.random.PRNGKey(0)
    k_params, k_x, k_big = jax.random.split(key, 3)

    params = init_params(k_params)
    packed = pack_params(params)

    # Small-batch check (matches Net.forward input: batch=2, state_dim=8).
    x = jax.random.normal(k_x, (2, 8), jnp.float32)
    out = jax.block_until_ready(net_forward(x, packed))
    ref = _reference_forward(x, params)
    assert out.shape == (2, 4)
    assert jnp.allclose(out, ref, atol=1e-4, rtol=1e-4)

    # Larger batch exercises the multi-step batch grid + ragged final block path.
    x_big = jax.random.normal(k_big, (1000, 8), jnp.float32)
    out_big = jax.block_until_ready(net_forward(x_big, packed))
    ref_big = _reference_forward(x_big, params)
    assert out_big.shape == (1000, 4)
    assert jnp.allclose(out_big, ref_big, atol=1e-4, rtol=1e-4)

    print("KERNEL_OK")
</pallas_src>

<mosaic_0001>
module attributes {stable_mosaic.version = 11 : i64} {
  func.func @_mlp_kernel(%arg0: i32, %arg1: memref<8x8xf32, #tpu.memory_space<vmem>>, %arg2: memref<288x128xf32, #tpu.memory_space<vmem>>, %arg3: memref<8x4xf32, #tpu.memory_space<vmem>>) attributes {dimension_semantics = [#tpu.dimension_semantics<parallel>], iteration_bounds = array<i64: 1>, scalar_prefetch = 0 : i64, scratch_operands = 0 : i64, tpu.core_type = #tpu.core_type<tc>, window_params = [{transform_indices = @transform_0, window_bounds = array<i64: 8, 8>}, {pipeline_mode = #tpu.pipeline_mode<synchronous>, transform_indices = @transform_1, window_bounds = array<i64: 288, 128>}, {transform_indices = @transform_2, window_bounds = array<i64: 8, 4>}]} {
    %c0 = arith.constant 0 : index
    %c0_0 = arith.constant 0 : index
    %0 = vector.load %arg1[%c0, %c0_0] : memref<8x8xf32, #tpu.memory_space<vmem>>, vector<8x8xf32>
    %c0_1 = arith.constant 0 : index
    %c0_2 = arith.constant 0 : index
    %1 = vector.load %arg2[%c0_1, %c0_2] : memref<288x128xf32, #tpu.memory_space<vmem>>, vector<8x128xf32>
    %c8 = arith.constant 8 : index
    %c0_3 = arith.constant 0 : index
    %2 = vector.load %arg2[%c8, %c0_3] : memref<288x128xf32, #tpu.memory_space<vmem>>, vector<128x128xf32>
    %c136 = arith.constant 136 : index
    %c0_4 = arith.constant 0 : index
    %3 = vector.load %arg2[%c136, %c0_4] : memref<288x128xf32, #tpu.memory_space<vmem>>, vector<128x128xf32>
    %c264 = arith.constant 264 : index
    %c0_5 = arith.constant 0 : index
    %4 = vector.load %arg2[%c264, %c0_5] : memref<288x128xf32, #tpu.memory_space<vmem>>, vector<1x128xf32>
    %c272 = arith.constant 272 : index
    %c0_6 = arith.constant 0 : index
    %5 = vector.load %arg2[%c272, %c0_6] : memref<288x128xf32, #tpu.memory_space<vmem>>, vector<1x128xf32>
    %c280 = arith.constant 280 : index
    %c0_7 = arith.constant 0 : index
    %6 = vector.load %arg2[%c280, %c0_7] : memref<288x128xf32, #tpu.memory_space<vmem>>, vector<1x128xf32>
    %cst = arith.constant dense<0.000000e+00> : vector<8x128xf32>
    %7 = tpu.matmul %0, %1, %cst {dimension_numbers = #tpu.dot_dimension_numbers<[1], [0], [0], [1], [0, 0, 1, 1], [], []>} : vector<8x8xf32>, vector<8x128xf32>, vector<8x128xf32> -> vector<8x128xf32>
    %8 = vector.broadcast %4 : vector<1x128xf32> to vector<8x128xf32>
    %9 = arith.addf %7, %8 : vector<8x128xf32>
    %cst_8 = arith.constant 0.000000e+00 : f32
    %10 = vector.broadcast %cst_8 : f32 to vector<8x128xf32>
    %11 = arith.maximumf %9, %10 : vector<8x128xf32>
    %cst_9 = arith.constant dense<0.000000e+00> : vector<8x128xf32>
    %12 = tpu.matmul %11, %2, %cst_9 {dimension_numbers = #tpu.dot_dimension_numbers<[1], [0], [0], [1], [0, 0, 1, 1], [], []>} : vector<8x128xf32>, vector<128x128xf32>, vector<8x128xf32> -> vector<8x128xf32>
    %13 = vector.broadcast %5 : vector<1x128xf32> to vector<8x128xf32>
    %14 = arith.addf %12, %13 : vector<8x128xf32>
    %cst_10 = arith.constant 0.000000e+00 : f32
    %15 = vector.broadcast %cst_10 : f32 to vector<8x128xf32>
    %16 = arith.maximumf %14, %15 : vector<8x128xf32>
    %cst_11 = arith.constant dense<0.000000e+00> : vector<8x128xf32>
    %17 = tpu.matmul %16, %3, %cst_11 {dimension_numbers = #tpu.dot_dimension_numbers<[1], [0], [0], [1], [0, 0, 1, 1], [], []>} : vector<8x128xf32>, vector<128x128xf32>, vector<8x128xf32> -> vector<8x128xf32>
    %18 = vector.broadcast %6 : vector<1x128xf32> to vector<8x128xf32>
    %19 = arith.addf %17, %18 : vector<8x128xf32>
    %20 = vector.extract_strided_slice %19 {offsets = [0, 0], sizes = [8, 4], strides = [1, 1]} : vector<8x128xf32> to vector<8x4xf32>
    %c0_12 = arith.constant 0 : index
    %c0_13 = arith.constant 0 : index
    %21 = vector.load %arg3[%c0_12, %c0_13] : memref<8x4xf32, #tpu.memory_space<vmem>>, vector<8x4xf32>
    tpu.vector_store %arg3[%c0_12, %c0_13], %20 {strides = array<i32>} : memref<8x4xf32, #tpu.memory_space<vmem>>, vector<8x4xf32>,
    return
  }
  func.func @transform_0(%arg0: i32) -> (i32, i32) {
    %c0_i32 = arith.constant 0 : i32
    %c0_i32_0 = arith.constant 0 : i32
    return %arg0, %c0_i32 : i32, i32
  }
  func.func @transform_1(%arg0: i32) -> (i32, i32) {
    %c0_i32 = arith.constant 0 : i32
    %c0_i32_0 = arith.constant 0 : i32
    %c0_i32_1 = arith.constant 0 : i32
    return %c0_i32, %c0_i32_0 : i32, i32
  }
  func.func @transform_2(%arg0: i32) -> (i32, i32) {
    %c0_i32 = arith.constant 0 : i32
    %c0_i32_0 = arith.constant 0 : i32
    return %arg0, %c0_i32 : i32, i32
  }
}

</mosaic_0001>

<bundles_post_ra>
// kernel: tpu_custom_call.1
= control target key start
LH: loop header
LB: loop body
LE: loop exit
PB: predicated region body
PF: predicated region fallthrough
CT: control target
= control target key end

     0   :  { %7 = vsyncpa [#allocation3], 0  ;;  %s593_s0 = inlined_call_operand.hbm [shape: f32[2,8], index: 0, kind: input, shape index: {}]   ;;  %s594_s1 = inlined_call_operand.hbm [shape: f32[288,128], index: 1, kind: input, shape index: {}]   ;;  %s595_s2 = inlined_call_operand.hbm [shape: f32[2,4], index: 2, kind: output, shape index: {}]  }
   0x1   :  { %8 = vsyncpa [#allocation6], 0 }
   0x2   :  { %9 = vsyncpa [#allocation4], 0 }
   0x3   :  { %14 = vsyncadd [#allocation3], 96  ;;  %s515_s9 = smov [#allocation2]  }
   0x4   :  { %s15_s10 = sshll.u32 %s515_s9, 4  ;;  %s16_s10 = int_to_ptr.vmem [resolvable:$true] %s15_s10 }
   0x5   :  { %s457_s11 = scalar_lea.vmem %s16_s10, 32  ;;  %s461_s12 = scalar_lea.vmem %s16_s10, 128 }
   0x6   :  { %p458_p0 = scmp.ne.s32.totalorder %s16_s10, %s457_s11  ;;  %p462_p1 = scmp.lt.s32.totalorder %s16_s10, %s16_s10 }
   0x7   :  { %p463_p2 = scmp.lt.s32.totalorder %s461_s12, %s457_s11 }
   0x9   :  { %p464_p3 = por %p463_p2, %p462_p1 }
   0xb   :  { %p465_p4 = pnand %p464_p3, %p458_p0 }
   0xd   :  { %468 = shalt.err (!%p465_p4)
}
   0xe   :  { %s516_s13 = smov 32   ;;  %s517_s14 = smov 2  }
   0xf   :  { %21 = dma.hbm_to_vmem [thread:$0]  %s593_s0, 32, %s16_s10, [#allocation3], %s516_s13, %s516_s13, %s517_s14  }
  0x10   :  { %s518_s17 = smov [#allocation5]  }
  0x11   :  { %s27_s18 = sshll.u32 %s518_s17, 4  ;;  %s28_s18 = int_to_ptr.vmem [resolvable:$true] %s27_s18 }
  0x12   :  { %s477_s19 = scalar_lea.vmem %s28_s18, 4608  ;;  %p482_p6 = scmp.lt.s32.totalorder %s28_s18, %s28_s18 }
  0x13   :  { %p478_p5 = scmp.ne.s32.totalorder %s28_s18, %s477_s19  ;;  %p483_p7 = scmp.lt.s32.totalorder %s477_s19, %s477_s19 }
  0x15   :  { %p484_p8 = por %p483_p7, %p482_p6 }
  0x17   :  { %p485_p9 = pnand %p484_p8, %p478_p5 }
  0x19   :  { %488 = shalt.err (!%p485_p9)
}
  0x1a   :  { %s519_s20 = smov 128   ;;  %s520_s21 = smov 8  }
  0x1b   :  { %33 = dma.hbm_to_vmem [thread:$0]  %s594_s1, 4608, %s28_s18, [#allocation6], %s519_s20, %s519_s20, %s520_s21  }
  0x1c   :  { %509 = dma.done.wait [#allocation3], 128  }
  0x1d   :  { %510 = vsyncadd [#allocation3], 4294967168 }
  0x1e   :  { %511 = dma.done.wait [#allocation6], 4608  }
  0x1f   :  { %512 = vsyncadd [#allocation6], 4294962688  ;;  %v521_v0 = vmov 0.0   ;;  %vm522_vm0 = vmmov 0   ;;  %vm81_vm1 = vcmask 64512   ;;  %v41_v1 = vld [vmem:[#allocation5] sm:$0xff] }
  0x20   :  { %365 = vmatprep.subr.mxu0 %v521_v0  ;;  %367 = vmatprep.mubr.msk.f32.mxu0 %vm522_vm0, %v521_v0  ;;  %v40_v2 = vld [vmem:[#allocation2] sm:$0xff]  ;;  %v57_v3 = vld [vmem:[#allocation5 + $0x80] sm:$0xff]  ;;  %v55_v5 = vld [vmem:[#allocation5 + $0x70] sm:$0xff]  ;;  %vm305_vm2 = vcmask 31744  }
  0x21   :  { %370 = vmatprep.subr.mxu1 %v521_v0  ;;  %402 = vmatprep.mubr.msk.f32.mxu1 %vm522_vm0, %v521_v0  ;;  %v56_v4 = vld [vmem:[#allocation5 + $0x78] sm:$0xff]  ;;  %v54_v6 = vld [vmem:[#allocation5 + $0x68] sm:$0xff]  ;;  %v53_v7 = vld [vmem:[#allocation5 + $0x60] sm:$0xff] }
  0x22   :  { %366 = vmatpush3.msra.mxu0 %v41_v1  ;;  %371 = vmatpush3.msra.mxu1 %v57_v3  ;;  %v52_v8 = vld [vmem:[#allocation5 + $0x58] sm:$0xff]  ;;  %v51_v9 = vld [vmem:[#allocation5 + $0x50] sm:$0xff]  ;;  %v50_v10 = vld [vmem:[#allocation5 + $0x48] sm:$0xff] }
  0x23   :  { %368 = vmatmul.mubr.msk.f32.vlgmr.msra.gmra.mxu0 %vm81_vm1, %v40_v2  ;;  %372 = vmatprep.subr.mxu1 %v521_v0  ;;  %v49_v11 = vld [vmem:[#allocation5 + $0x40] sm:$0xff]  ;;  %v48_v12 = vld [vmem:[#allocation5 + $0x38] sm:$0xff]  ;;  %v47_v13 = vld [vmem:[#allocation5 + $0x30] sm:$0xff] }
  0x24   :  { %373 = vmatpush3.msra.mxu1 %v56_v4  ;;  %405 = vmatprep.subr.mxu0 %v521_v0  ;;  %v46_v14 = vld [vmem:[#allocation5 + $0x28] sm:$0xff]  ;;  %v45_v15 = vld [vmem:[#allocation5 + $0x20] sm:$0xff]  ;;  %v44_v16 = vld [vmem:[#allocation5 + $0x18] sm:$0xff] }
  0x25   :  { %374 = vmatprep.subr.mxu1 %v521_v0  ;;  %437 = vmatprep.mubr.msk.f32.mxu0 %vm522_vm0, %v521_v0  ;;  %v43_v17 = vld [vmem:[#allocation5 + $0x10] sm:$0xff]  ;;  %v42_v18 = vld [vmem:[#allocation5 + $0x8] sm:$0xff]  ;;  %v73_v19 = vld [vmem:[#allocation5 + $0x100] sm:$0xff] }
  0x26   :  { %375 = vmatpush3.msra.mxu1 %v55_v5  ;;  %v72_v20 = vld [vmem:[#allocation5 + $0xf8] sm:$0xff]  ;;  %406 = vmatpush3.msra.mxu0 %v73_v19  ;;  %v71_v21 = vld [vmem:[#allocation5 + $0xf0] sm:$0xff]  ;;  %v70_v22 = vld [vmem:[#allocation5 + $0xe8] sm:$0xff] }
  0x27   :  { %376 = vmatprep.subr.mxu1 %v521_v0  ;;  %407 = vmatprep.subr.mxu0 %v521_v0  ;;  %v69_v23 = vld [vmem:[#allocation5 + $0xe0] sm:$0xff]  ;;  %v68_v24 = vld [vmem:[#allocation5 + $0xd8] sm:$0xff]  ;;  %v67_v25 = vld [vmem:[#allocation5 + $0xd0] sm:$0xff] }
  0x28   :  { %377 = vmatpush3.msra.mxu1 %v54_v6  ;;  %408 = vmatpush3.msra.mxu0 %v72_v20  ;;  %v66_v26 = vld [vmem:[#allocation5 + $0xc8] sm:$0xff]  ;;  %v65_v27 = vld [vmem:[#allocation5 + $0xc0] sm:$0xff]  ;;  %v64_v28 = vld [vmem:[#allocation5 + $0xb8] sm:$0xff] }
  0x29   :  { %378 = vmatprep.subr.mxu1 %v521_v0  ;;  %409 = vmatprep.subr.mxu0 %v521_v0  ;;  %v63_v29 = vld [vmem:[#allocation5 + $0xb0] sm:$0xff]  ;;  %v62_v30 = vld [vmem:[#allocation5 + $0xa8] sm:$0xff]  ;;  %v61_v31 = vld [vmem:[#allocation5 + $0xa0] sm:$0xff] }
  0x2a   :  { %379 = vmatpush3.msra.mxu1 %v53_v7  ;;  %410 = vmatpush3.msra.mxu0 %v71_v21  ;;  %v325_v32 = vld [vmem:[#allocation5 + $0x108] ss:$0 sm:$0xff]  ;;  %v60_v37 = vld [vmem:[#allocation5 + $0x98] sm:$0xff]  ;;  %v59_v38 = vld [vmem:[#allocation5 + $0x90] sm:$0xff] }
  0x2b   :  { %380 = vmatprep.subr.mxu1 %v521_v0  ;;  %411 = vmatprep.subr.mxu0 %v521_v0  ;;  %v58_v39 = vld [vmem:[#allocation5 + $0x88] sm:$0xff]  ;;  %v327_v40 = vld [vmem:[#allocation5 + $0x110] ss:$0 sm:$0xff]  ;;  %v328_v45 = vld [vmem:[#allocation5 + $0x118] ss:$0 sm:$0xff] }
  0x2c   :  { %381 = vmatpush3.msra.mxu1 %v52_v8  ;;  %412 = vmatpush3.msra.mxu0 %v70_v22 }
  0x2d   :  { %382 = vmatprep.subr.mxu1 %v521_v0  ;;  %413 = vmatprep.subr.mxu0 %v521_v0 }
  0x2e   :  { %383 = vmatpush3.msra.mxu1 %v51_v9  ;;  %414 = vmatpush3.msra.mxu0 %v69_v23 }
  0x2f   :  { %384 = vmatprep.subr.mxu1 %v521_v0  ;;  %415 = vmatprep.subr.mxu0 %v521_v0 }
  0x30   :  { %385 = vmatpush3.msra.mxu1 %v50_v10  ;;  %416 = vmatpush3.msra.mxu0 %v68_v24 }
  0x31   :  { %386 = vmatprep.subr.mxu1 %v521_v0  ;;  %417 = vmatprep.subr.mxu0 %v521_v0 }
  0x32   :  { %387 = vmatpush3.msra.mxu1 %v49_v11  ;;  %418 = vmatpush3.msra.mxu0 %v67_v25 }
  0x33   :  { %388 = vmatprep.subr.mxu1 %v521_v0  ;;  %419 = vmatprep.subr.mxu0 %v521_v0 }
  0x34   :  { %389 = vmatpush3.msra.mxu1 %v48_v12  ;;  %420 = vmatpush3.msra.mxu0 %v66_v26 }
  0x35   :  { %390 = vmatprep.subr.mxu1 %v521_v0  ;;  %421 = vmatprep.subr.mxu0 %v521_v0 }
  0x36   :  { %391 = vmatpush3.msra.mxu1 %v47_v13  ;;  %422 = vmatpush3.msra.mxu0 %v65_v27 }
  0x37   :  { %392 = vmatprep.subr.mxu1 %v521_v0  ;;  %423 = vmatprep.subr.mxu0 %v521_v0 }
  0x38   :  { %393 = vmatpush3.msra.mxu1 %v46_v14  ;;  %424 = vmatpush3.msra.mxu0 %v64_v28 }
  0x39   :  { %394 = vmatprep.subr.mxu1 %v521_v0  ;;  %425 = vmatprep.subr.mxu0 %v521_v0 }
  0x3a   :  { %395 = vmatpush3.msra.mxu1 %v45_v15  ;;  %426 = vmatpush3.msra.mxu0 %v63_v29 }
  0x3b   :  { %396 = vmatprep.subr.mxu1 %v521_v0  ;;  %427 = vmatprep.subr.mxu0 %v521_v0 }
  0x3c   :  { %397 = vmatpush3.msra.mxu1 %v44_v16  ;;  %428 = vmatpush3.msra.mxu0 %v62_v30 }
  0x3d   :  { %398 = vmatprep.subr.mxu1 %v521_v0  ;;  %429 = vmatprep.subr.mxu0 %v521_v0 }
  0x3e   :  { %399 = vmatpush3.msra.mxu1 %v43_v17  ;;  %430 = vmatpush3.msra.mxu0 %v61_v31 }
  0x3f   :  { %400 = vmatprep.subr.mxu1 %v521_v0  ;;  %431 = vmatprep.subr.mxu0 %v521_v0 }
  0x40   :  { %401 = vmatpush3.msra.mxu1 %v42_v18  ;;  %432 = vmatpush3.msra.mxu0 %v60_v37 }
  0x41   :  { %433 = vmatprep.subr.mxu0 %v521_v0 }
  0x42   :  { %434 = vmatpush3.msra.mxu0 %v59_v38 }
  0x43   :  { %435 = vmatprep.subr.mxu0 %v521_v0 }
  0x44   :  { %436 = vmatpush3.msra.mxu0 %v58_v39 }
  0xe3   :  { %v151_v33 = vpop.f32.mrf.mxu0 }
  0xe4   :  { %v152_v34 = vadd.f32 %v325_v32, %v151_v33 }
  0xe5   :  { %v369_v35 = vpop.f32.mrf.mxu0 }
  0xe6   :  { %v155_v36 = vmax.f32 %v152_v34, 0.0 }
  0xe8   :  { %403 = vmatmul.mubr.f32.vlgmr.msra.gmra.mxu1 %v155_v36 }
 0x1a8   :  { %v226_v41 = vpop.f32.mrf.mxu1 }
 0x1a9   :  { %v227_v42 = vadd.f32 %v327_v40, %v226_v41 }
 0x1aa   :  { %v404_v43 = vpop.f32.mrf.mxu1 }
 0x1ab   :  { %v230_v44 = vmax.f32 %v227_v42, 0.0 }
 0x1ad   :  { %438 = vmatmul.mubr.f32.vlgmr.msra.gmra.mxu0 %v230_v44 }
 0x26d   :  { %v301_v46 = vpop.f32.mrf.mxu0 }
 0x26e   :  { %v302_v47 = vadd.f32 %v328_v45, %v301_v46 }
 0x26f   :  { %v439_v48 = vpop.f32.mrf.mxu0 }
 0x270   :  { %306 = vst.msk [vmem:[#allocation7] sm:$0xff] %vm305_vm2, %v302_v47 }
 0x271   :  { %311 = vsyncadd [#allocation4], 96  ;;  %s523_s0 = smov [#allocation7]  }
 0x272   :  { %s312_s1 = sshll.u32 %s523_s0, 4  ;;  %s313_s1 = int_to_ptr.vmem [resolvable:$true] %s312_s1 }
 0x273   :  { %s489_s24 = scalar_lea.vmem %s313_s1, 32  ;;  %s493_s25 = scalar_lea.vmem %s313_s1, 128 }
 0x274   :  { %p490_p10 = scmp.ne.s32.totalorder %s313_s1, %s489_s24  ;;  %p494_p11 = scmp.lt.s32.totalorder %s313_s1, %s313_s1 }
 0x275   :  { %p495_p12 = scmp.lt.s32.totalorder %s493_s25, %s489_s24 }
 0x277   :  { %p496_p13 = por %p495_p12, %p494_p11 }
 0x279   :  { %p497_p0 = pnand %p496_p13, %p490_p10 }
 0x27b   :  { %500 = shalt.err (!%p497_p0)
}
 0x27c   :  { %318 = dma.vmem_to_hbm [thread:$0]  %s313_s1, 32, %s595_s2, [#allocation4], %s516_s13, %s516_s13, %s517_s14  }
 0x27d   :  { %513 = dma.done.wait [#allocation4], 128  }
 0x27e   :  { %514 = vsyncadd [#allocation4], 4294967168 }
 0x27f   :  { %322 = vsyncpa [#allocation3], 1 }
 0x280   :  { %323 = vsyncpa [#allocation6], 1 }
 0x281   :  { %324 = vsyncpa [#allocation4], 1 }

</bundles_post_ra>
